<compile_context>
chip_gen: v5e
topology: v5e:2x2
jax: 0.10.0
libtpu: 0.0.40
codegen_flags: <defaults>
</compile_context>

<pallas_src>
import jax
import jax.numpy as jnp
from jax.experimental import pallas as pl
from jax.experimental.pallas import tpu as pltpu


def _upsample_kernel(x_ref, s_ref, o_ref):
    # x_ref: (rb, g*W)   s_ref: (g*W, g*s*s*W)   o_ref: (rb, g*s*s*W)
    o_ref[...] = jnp.dot(
        x_ref[...], s_ref[...], preferred_element_type=jnp.float32
    ).astype(o_ref.dtype)


def _pick_row_group(H, W):
    """Smallest divisor g of H with g*W >= 128 (lane-dense slab); else g = H."""
    if W >= 128:
        return 1
    target = (128 + W - 1) // W
    for d in range(1, H + 1):
        if H % d == 0 and d >= target:
            return d
    return H


def _build_selection_matrix(W, s, g, dtype):
    """Block-diagonal 0/1 matrix mapping g input rows of width W to the
    g*s contiguous nearest-upsampled output rows of width W*s (flattened)."""
    Wo = W * s
    q = jnp.arange(s * Wo)
    src_col = (q % Wo) // s                                           # (s*Wo,)
    S2 = (jnp.arange(W)[:, None] == src_col[None, :]).astype(dtype)   # (W, s*Wo)
    if g == 1:
        return S2
    return jnp.kron(jnp.eye(g, dtype=dtype), S2)                      # (g*W, g*s*Wo)


def interpolate_nearest(x, scale_factor):
    """Equivalent of F.interpolate(x, scale_factor=s) (mode='nearest'), NCHW."""
    s = int(scale_factor)
    if s != scale_factor or s < 1:
        # TODO(synk): non-integer scale_factor (PyTorch nearest floor-index rule)
        # not implemented.
        raise NotImplementedError("only positive integer scale_factor supported")
    N, C, H, W = x.shape
    Ho, Wo = H * s, W * s
    if s == 1:
        return x

    orig_dtype = x.dtype
    if jnp.issubdtype(orig_dtype, jnp.floating):
        cdt = orig_dtype            # bf16/f32 stay in their native dtype
        xc = x
    else:
        # TODO(synk): integer dtypes go through f32 (exact only for |v| < 2**24).
        cdt = jnp.float32
        xc = x.astype(cdt)

    g = _pick_row_group(H, W)
    rows = (N * C * H) // g          # total slab rows
    lin = g * W                      # input lane width
    lout = g * s * Wo                # output lane width (= g*s*s*W)

    sel = _build_selection_matrix(W, s, g, cdt)      # (lin, lout)
    x2 = xc.reshape(rows, lin)                       # contiguous (free) reshape

    itemsize = jnp.dtype(cdt).itemsize
    # ~6 MiB of in+out per grid step -> ~12 MiB double-buffered (+ sel),
    # comfortably inside a 32 MiB scoped-VMEM limit on all generations.
    per_row_bytes = lin * itemsize * (1 + s * s)
    rows_fit = max(1, (6 * 1024 * 1024) // per_row_bytes)
    if rows_fit >= rows:
        rb = rows
    else:
        rb = max(8, (rows_fit // 8) * 8)   # keep sublane dim a multiple of 8
        rb = min(rb, rows)
    grid = (pl.cdiv(rows, rb),)

    cost = pl.CostEstimate(
        flops=2 * rows * lin * lout,
        transcendentals=0,
        bytes_accessed=(N * C * H * W + N * C * Ho * Wo) * itemsize
        + sel.size * itemsize,
    )

    out2 = pl.pallas_call(
        _upsample_kernel,
        out_shape=jax.ShapeDtypeStruct((rows, lout), cdt),
        grid=grid,
        in_specs=[
            pl.BlockSpec((rb, lin), lambda i: (i, 0)),
            pl.BlockSpec((lin, lout), lambda i: (0, 0)),  # constant -> resident
        ],
        out_specs=pl.BlockSpec((rb, lout), lambda i: (i, 0)),
        compiler_params=pltpu.CompilerParams(
            dimension_semantics=("parallel",),
            vmem_limit_bytes=32 * 1024 * 1024,
        ),
        cost_estimate=cost,
    )(x2, sel)

    out = out2.reshape(N, C, Ho, Wo)                 # contiguous (free) reshape
    if out.dtype != orig_dtype:
        out = out.astype(orig_dtype)
    return out


class InterpolateLayer:
    """JAX/Pallas port of the PyTorch InterpolateLayer (no parameters)."""

    def __init__(self, scale_factor):
        self.scale_factor = scale_factor

    def __call__(self, x):
        return interpolate_nearest(x, self.scale_factor)


if __name__ == "__main__":
    key = jax.random.PRNGKey(0)
    N, C, H, W = 2, 4, 16, 16
    scale_factor = 2

    x = jax.random.normal(key, (N, C, H, W), dtype=jnp.float32)

    layer = InterpolateLayer(scale_factor)
    out = layer(x)
    out = jax.block_until_ready(out)

    # Reference (plain JAX) nearest-neighbour upsample.
    ref = jnp.repeat(jnp.repeat(x, scale_factor, axis=2), scale_factor, axis=3)
    assert out.shape == (N, C, H * scale_factor, W * scale_factor), out.shape
    assert jnp.allclose(out, ref), "mismatch vs reference nearest upsample"

    print("KERNEL_OK")
</pallas_src>

<mosaic_0001>
module attributes {stable_mosaic.version = 11 : i64} {
  func.func @_upsample_kernel(%arg0: i32, %arg1: memref<16x128xf32, #tpu.memory_space<vmem>>, %arg2: memref<128x512xf32, #tpu.memory_space<vmem>>, %arg3: memref<16x512xf32, #tpu.memory_space<vmem>>) attributes {dimension_semantics = [#tpu.dimension_semantics<parallel>], iteration_bounds = array<i64: 1>, scalar_prefetch = 0 : i64, scratch_operands = 0 : i64, tpu.core_type = #tpu.core_type<tc>, window_params = [{transform_indices = @transform_0, window_bounds = array<i64: 16, 128>}, {pipeline_mode = #tpu.pipeline_mode<synchronous>, transform_indices = @transform_1, window_bounds = array<i64: 128, 512>}, {transform_indices = @transform_2, window_bounds = array<i64: 16, 512>}]} {
    %c0 = arith.constant 0 : index
    %c0_0 = arith.constant 0 : index
    %0 = vector.load %arg1[%c0, %c0_0] : memref<16x128xf32, #tpu.memory_space<vmem>>, vector<16x128xf32>
    %c0_1 = arith.constant 0 : index
    %c0_2 = arith.constant 0 : index
    %1 = vector.load %arg2[%c0_1, %c0_2] : memref<128x512xf32, #tpu.memory_space<vmem>>, vector<128x512xf32>
    %cst = arith.constant dense<0.000000e+00> : vector<16x512xf32>
    %2 = tpu.matmul %0, %1, %cst {dimension_numbers = #tpu.dot_dimension_numbers<[1], [0], [0], [1], [0, 0, 1, 1], [], []>} : vector<16x128xf32>, vector<128x512xf32>, vector<16x512xf32> -> vector<16x512xf32>
    %c0_3 = arith.constant 0 : index
    %c0_4 = arith.constant 0 : index
    %3 = vector.load %arg3[%c0_3, %c0_4] : memref<16x512xf32, #tpu.memory_space<vmem>>, vector<16x512xf32>
    tpu.vector_store %arg3[%c0_3, %c0_4], %2 {strides = array<i32>} : memref<16x512xf32, #tpu.memory_space<vmem>>, vector<16x512xf32>,
    return
  }
  func.func @transform_0(%arg0: i32) -> (i32, i32) {
    %c0_i32 = arith.constant 0 : i32
    %c0_i32_0 = arith.constant 0 : i32
    return %arg0, %c0_i32 : i32, i32
  }
  func.func @transform_1(%arg0: i32) -> (i32, i32) {
    %c0_i32 = arith.constant 0 : i32
    %c0_i32_0 = arith.constant 0 : i32
    %c0_i32_1 = arith.constant 0 : i32
    return %c0_i32, %c0_i32_0 : i32, i32
  }
  func.func @transform_2(%arg0: i32) -> (i32, i32) {
    %c0_i32 = arith.constant 0 : i32
    %c0_i32_0 = arith.constant 0 : i32
    return %arg0, %c0_i32 : i32, i32
  }
}

</mosaic_0001>

<bundles_post_ra>
// kernel: tpu_custom_call.1
= control target key start
LH: loop header
LB: loop body
LE: loop exit
PB: predicated region body
PF: predicated region fallthrough
CT: control target
= control target key end

     0   :  { %7 = vsyncpa [#allocation3], 0  ;;  %s352_s0 = inlined_call_operand.hbm [shape: f32[16,128], index: 0, kind: input, shape index: {}]   ;;  %s353_s1 = inlined_call_operand.hbm [shape: f32[128,512], index: 1, kind: input, shape index: {}]   ;;  %s354_s2 = inlined_call_operand.hbm [shape: f32[16,512], index: 2, kind: output, shape index: {}]  }
   0x1   :  { %8 = vsyncpa [#allocation6], 0 }
   0x2   :  { %9 = vsyncpa [#allocation4], 0  ;;  %s14_s11 = sshll.u32 %s352_s0, 4  ;;  %s315_s12 = smov [#allocation2]   ;;  %s15_s11 = int_to_ptr.hbm [resolvable:$true] %s14_s11 }
   0x3   :  { %s16_s13 = sshll.u32 %s315_s12, 4  ;;  %s27_s16 = sshll.u32 %s353_s1, 4  ;;  %s17_s13 = int_to_ptr.vmem [resolvable:$true] %s16_s13  ;;  %s28_s16 = int_to_ptr.hbm [resolvable:$true] %s27_s16 }
   0x4   :  { %s316_s17 = smov 128   ;;  %s317_s18 = smov 8  }
   0x5   :  { %22 = dma.hbm_to_vmem [thread:$0]  %s15_s11, 256, %s17_s13, [#allocation3], %s316_s17, %s316_s17, %s317_s18  }
   0x6   :  { %s318_s19 = smov [#allocation5]   ;;  %s319_s21 = smov 512  }
   0x7   :  { %s29_s20 = sshll.u32 %s318_s19, 4  ;;  %s320_s22 = smov 32   ;;  %s30_s20 = int_to_ptr.vmem [resolvable:$true] %s29_s20 }
   0x8   :  { %35 = dma.hbm_to_vmem [thread:$0]  %s28_s16, 8192, %s30_s20, [#allocation6], %s319_s21, %s319_s21, %s320_s22  }
   0x9   :  { %309 = dma.done.wait [#allocation3], 256  }
   0xa   :  { %310 = vsyncadd [#allocation3], 4294967040 }
   0xb   :  { %311 = dma.done.wait [#allocation6], 8192  }
   0xc   :  { %312 = vsyncadd [#allocation6], 4294959104  ;;  %v108_v0 = vld [vmem:[#allocation5 + $0x1f0] sm:$0xff]  ;;  %v109_v1 = vld [vmem:[#allocation5 + $0x1f8] sm:$0xff]  ;;  %s321_s0 = smov [#allocation7]   ;;  %s216_s25 = sshll.u32 %s354_s2, 4  ;;  %s217_s25 = int_to_ptr.hbm [resolvable:$true] %s216_s25 }
   0xd   :  { %v104_v2 = vld [vmem:[#allocation5 + $0x1d0] sm:$0xff]  ;;  %156 = vmatpush.msra.mxu2 %v108_v0  ;;  %179 = vmatpush.msra.mxu3 %v109_v1  ;;  %v105_v3 = vld [vmem:[#allocation5 + $0x1d8] sm:$0xff]  ;;  %v106_v6 = vld [vmem:[#allocation5 + $0x1e0] sm:$0xff]  ;;  %s214_s1 = sshll.u32 %s321_s0, 4  ;;  %s215_s1 = int_to_ptr.vmem [resolvable:$true] %s214_s1 }
   0xe   :  { %v100_v4 = vld [vmem:[#allocation5 + $0x1b0] sm:$0xff]  ;;  %v101_v5 = vld [vmem:[#allocation5 + $0x1b8] sm:$0xff]  ;;  %v107_v7 = vld [vmem:[#allocation5 + $0x1e8] sm:$0xff]  ;;  %110 = vmatpush.msra.mxu0 %v106_v6 }
   0xf   :  { %157 = vmatpush.msra.mxu2 %v104_v2  ;;  %180 = vmatpush.msra.mxu3 %v105_v3  ;;  %v102_v8 = vld [vmem:[#allocation5 + $0x1c0] sm:$0xff]  ;;  %v103_v9 = vld [vmem:[#allocation5 + $0x1c8] sm:$0xff]  ;;  %v96_v10 = vld [vmem:[#allocation5 + $0x190] sm:$0xff] }
  0x10   :  { %133 = vmatpush.msra.mxu1 %v107_v7  ;;  %v97_v11 = vld [vmem:[#allocation5 + $0x198] sm:$0xff]  ;;  %v98_v12 = vld [vmem:[#allocation5 + $0x1a0] sm:$0xff]  ;;  %v99_v13 = vld [vmem:[#allocation5 + $0x1a8] sm:$0xff]  ;;  %111 = vmatpush.msra.mxu0 %v102_v8 }
  0x11   :  { %158 = vmatpush.msra.mxu2 %v100_v4  ;;  %181 = vmatpush.msra.mxu3 %v101_v5  ;;  %v92_v14 = vld [vmem:[#allocation5 + $0x170] sm:$0xff]  ;;  %v93_v15 = vld [vmem:[#allocation5 + $0x178] sm:$0xff]  ;;  %v94_v16 = vld [vmem:[#allocation5 + $0x180] sm:$0xff] }
  0x12   :  { %134 = vmatpush.msra.mxu1 %v103_v9  ;;  %v95_v17 = vld [vmem:[#allocation5 + $0x188] sm:$0xff]  ;;  %112 = vmatpush.msra.mxu0 %v98_v12  ;;  %v88_v18 = vld [vmem:[#allocation5 + $0x150] sm:$0xff]  ;;  %v89_v19 = vld [vmem:[#allocation5 + $0x158] sm:$0xff] }
  0x13   :  { %159 = vmatpush.msra.mxu2 %v96_v10  ;;  %182 = vmatpush.msra.mxu3 %v97_v11  ;;  %v90_v20 = vld [vmem:[#allocation5 + $0x160] sm:$0xff]  ;;  %v91_v21 = vld [vmem:[#allocation5 + $0x168] sm:$0xff]  ;;  %v84_v22 = vld [vmem:[#allocation5 + $0x130] sm:$0xff] }
  0x14   :  { %135 = vmatpush.msra.mxu1 %v99_v13  ;;  %113 = vmatpush.msra.mxu0 %v94_v16  ;;  %v85_v23 = vld [vmem:[#allocation5 + $0x138] sm:$0xff]  ;;  %v86_v24 = vld [vmem:[#allocation5 + $0x140] sm:$0xff]  ;;  %v87_v25 = vld [vmem:[#allocation5 + $0x148] sm:$0xff] }
  0x15   :  { %160 = vmatpush.msra.mxu2 %v92_v14  ;;  %183 = vmatpush.msra.mxu3 %v93_v15  ;;  %v80_v26 = vld [vmem:[#allocation5 + $0x110] sm:$0xff]  ;;  %v81_v27 = vld [vmem:[#allocation5 + $0x118] sm:$0xff]  ;;  %v82_v28 = vld [vmem:[#allocation5 + $0x120] sm:$0xff] }
  0x16   :  { %136 = vmatpush.msra.mxu1 %v95_v17  ;;  %114 = vmatpush.msra.mxu0 %v90_v20  ;;  %v83_v29 = vld [vmem:[#allocation5 + $0x128] sm:$0xff]  ;;  %v76_v30 = vld [vmem:[#allocation5 + $0xf0] sm:$0xff]  ;;  %v77_v31 = vld [vmem:[#allocation5 + $0xf8] sm:$0xff] }
  0x17   :  { %161 = vmatpush.msra.mxu2 %v88_v18  ;;  %184 = vmatpush.msra.mxu3 %v89_v19  ;;  %v78_v32 = vld [vmem:[#allocation5 + $0x100] sm:$0xff]  ;;  %v79_v33 = vld [vmem:[#allocation5 + $0x108] sm:$0xff]  ;;  %v72_v34 = vld [vmem:[#allocation5 + $0xd0] sm:$0xff] }
  0x18   :  { %137 = vmatpush.msra.mxu1 %v91_v21  ;;  %115 = vmatpush.msra.mxu0 %v86_v24  ;;  %v73_v35 = vld [vmem:[#allocation5 + $0xd8] sm:$0xff]  ;;  %v74_v36 = vld [vmem:[#allocation5 + $0xe0] sm:$0xff]  ;;  %v75_v37 = vld [vmem:[#allocation5 + $0xe8] sm:$0xff] }
  0x19   :  { %162 = vmatpush.msra.mxu2 %v84_v22  ;;  %185 = vmatpush.msra.mxu3 %v85_v23  ;;  %v68_v38 = vld [vmem:[#allocation5 + $0xb0] sm:$0xff]  ;;  %v69_v39 = vld [vmem:[#allocation5 + $0xb8] sm:$0xff]  ;;  %v70_v40 = vld [vmem:[#allocation5 + $0xc0] sm:$0xff] }
  0x1a   :  { %138 = vmatpush.msra.mxu1 %v87_v25  ;;  %116 = vmatpush.msra.mxu0 %v82_v28  ;;  %v71_v41 = vld [vmem:[#allocation5 + $0xc8] sm:$0xff]  ;;  %v64_v42 = vld [vmem:[#allocation5 + $0x90] sm:$0xff]  ;;  %v65_v43 = vld [vmem:[#allocation5 + $0x98] sm:$0xff] }
  0x1b   :  { %163 = vmatpush.msra.mxu2 %v80_v26  ;;  %186 = vmatpush.msra.mxu3 %v81_v27  ;;  %v66_v44 = vld [vmem:[#allocation5 + $0xa0] sm:$0xff]  ;;  %v67_v45 = vld [vmem:[#allocation5 + $0xa8] sm:$0xff]  ;;  %v60_v46 = vld [vmem:[#allocation5 + $0x70] sm:$0xff] }
  0x1c   :  { %139 = vmatpush.msra.mxu1 %v83_v29  ;;  %117 = vmatpush.msra.mxu0 %v78_v32  ;;  %v61_v47 = vld [vmem:[#allocation5 + $0x78] sm:$0xff]  ;;  %v62_v48 = vld [vmem:[#allocation5 + $0x80] sm:$0xff]  ;;  %v63_v49 = vld [vmem:[#allocation5 + $0x88] sm:$0xff] }
  0x1d   :  { %164 = vmatpush.msra.mxu2 %v76_v30  ;;  %187 = vmatpush.msra.mxu3 %v77_v31  ;;  %v56_v50 = vld [vmem:[#allocation5 + $0x50] sm:$0xff]  ;;  %v57_v51 = vld [vmem:[#allocation5 + $0x58] sm:$0xff]  ;;  %v58_v52 = vld [vmem:[#allocation5 + $0x60] sm:$0xff] }
  0x1e   :  { %140 = vmatpush.msra.mxu1 %v79_v33  ;;  %118 = vmatpush.msra.mxu0 %v74_v36  ;;  %v59_v53 = vld [vmem:[#allocation5 + $0x68] sm:$0xff]  ;;  %v52_v54 = vld [vmem:[#allocation5 + $0x30] sm:$0xff]  ;;  %v53_v55 = vld [vmem:[#allocation5 + $0x38] sm:$0xff] }
  0x1f   :  { %165 = vmatpush.msra.mxu2 %v72_v34  ;;  %188 = vmatpush.msra.mxu3 %v73_v35  ;;  %v54_v56 = vld [vmem:[#allocation5 + $0x40] sm:$0xff]  ;;  %v55_v57 = vld [vmem:[#allocation5 + $0x48] sm:$0xff]  ;;  %v48_v58 = vld [vmem:[#allocation5 + $0x10] sm:$0xff] }
  0x20   :  { %141 = vmatpush.msra.mxu1 %v75_v37  ;;  %119 = vmatpush.msra.mxu0 %v70_v40  ;;  %v49_v59 = vld [vmem:[#allocation5 + $0x18] sm:$0xff]  ;;  %v44_v60 = vld [vmem:[#allocation2] sm:$0xff]  ;;  %v50_v61 = vld [vmem:[#allocation5 + $0x20] sm:$0xff] }
  0x21   :  { %166 = vmatpush.msra.mxu2 %v68_v38  ;;  %189 = vmatpush.msra.mxu3 %v69_v39  ;;  %v51_v62 = vld [vmem:[#allocation5 + $0x28] sm:$0xff]  ;;  %v46_v63 = vld [vmem:[#allocation5] sm:$0xff]  ;;  %v45_v1 = vld [vmem:[#allocation2 + $0x8] sm:$0xff] }
  0x22   :  { %142 = vmatpush.msra.mxu1 %v71_v41  ;;  %120 = vmatpush.msra.mxu0 %v66_v44  ;;  %v47_v0 = vld [vmem:[#allocation5 + $0x8] sm:$0xff] }
  0x23   :  { %167 = vmatpush.msra.mxu2 %v64_v42  ;;  %190 = vmatpush.msra.mxu3 %v65_v43 }
  0x24   :  { %143 = vmatpush.msra.mxu1 %v67_v45  ;;  %121 = vmatpush.msra.mxu0 %v62_v48 }
  0x25   :  { %168 = vmatpush.msra.mxu2 %v60_v46  ;;  %191 = vmatpush.msra.mxu3 %v61_v47 }
  0x26   :  { %144 = vmatpush.msra.mxu1 %v63_v49  ;;  %122 = vmatpush.msra.mxu0 %v58_v52 }
  0x27   :  { %169 = vmatpush.msra.mxu2 %v56_v50  ;;  %192 = vmatpush.msra.mxu3 %v57_v51 }
  0x28   :  { %145 = vmatpush.msra.mxu1 %v59_v53  ;;  %123 = vmatpush.msra.mxu0 %v54_v56 }
  0x29   :  { %170 = vmatpush.msra.mxu2 %v52_v54  ;;  %193 = vmatpush.msra.mxu3 %v53_v55 }
  0x2a   :  { %146 = vmatpush.msra.mxu1 %v55_v57  ;;  %124 = vmatpush.msra.mxu0 %v50_v61 }
  0x2b   :  { %171 = vmatpush.msra.mxu2 %v48_v58  ;;  %194 = vmatpush.msra.mxu3 %v49_v59 }
  0x2c   :  { %172 = vmatmul.f32.vlgmr.msra.gmra.mxu2 %v44_v60  ;;  %195 = vmatmul.f32.vlgmr.msra.gmra.mxu3 %v44_v60 }
  0x2d   :  { %147 = vmatpush.msra.mxu1 %v51_v62  ;;  %125 = vmatpush.msra.mxu0 %v46_v63 }
  0x2e   :  { %126 = vmatmul.f32.vlgmr.msra.gmra.mxu0 %v44_v60 }
  0x2f   :  { %148 = vmatpush.msra.mxu1 %v47_v0 }
  0x30   :  { %149 = vmatmul.f32.vlgmr.msra.gmra.mxu1 %v44_v60 }
  0x34   :  { %175 = vmatmul.f32.gmra.mxu2 %v45_v1  ;;  %198 = vmatmul.f32.gmra.mxu3 %v45_v1 }
  0x36   :  { %129 = vmatmul.f32.gmra.mxu0 %v45_v1 }
  0x38   :  { %152 = vmatmul.f32.gmra.mxu1 %v45_v1 }
  0xab   :  { %v127_v2 = vpop.f32.mrf.mxu0 }
  0xac   :  { %202 = vst [vmem:[#allocation7] sm:$0xff] %v127_v2 }
  0xad   :  { %v150_v3 = vpop.f32.mrf.mxu1 }
  0xae   :  { %203 = vst [vmem:[#allocation7 + $0x8] sm:$0xff] %v150_v3 }
  0xaf   :  { %v173_v4 = vpop.f32.mrf.mxu2  ;;  %v196_v5 = vpop.f32.mrf.mxu3 }
  0xb0   :  { %204 = vst [vmem:[#allocation7 + $0x10] sm:$0xff] %v173_v4 }
  0xb1   :  { %205 = vst [vmem:[#allocation7 + $0x18] sm:$0xff] %v196_v5 }
  0xb3   :  { %v130_v6 = vpop.f32.mrf.mxu0 }
  0xb4   :  { %206 = vst [vmem:[#allocation7 + $0x20] sm:$0xff] %v130_v6 }
  0xb5   :  { %v153_v7 = vpop.f32.mrf.mxu1 }
  0xb6   :  { %207 = vst [vmem:[#allocation7 + $0x28] sm:$0xff] %v153_v7 }
  0xb7   :  { %v176_v8 = vpop.f32.mrf.mxu2  ;;  %v199_v9 = vpop.f32.mrf.mxu3 }
  0xb8   :  { %208 = vst [vmem:[#allocation7 + $0x30] sm:$0xff] %v176_v8 }
  0xb9   :  { %209 = vst [vmem:[#allocation7 + $0x38] sm:$0xff] %v199_v9 }
  0xba   :  { %222 = dma.vmem_to_hbm [thread:$0]  %s215_s1, 1024, %s217_s25, [#allocation4], %s319_s21, %s319_s21, %s320_s22  }
  0xbb   :  { %313 = dma.done.wait [#allocation4], 1024  }
  0xbc   :  { %314 = vsyncadd [#allocation4], 4294966272 }
  0xbd   :  { %227 = vsyncpa [#allocation3], 1 }
  0xbe   :  { %228 = vsyncpa [#allocation6], 1 }
  0xbf   :  { %229 = vsyncpa [#allocation4], 1 }

</bundles_post_ra>
